<compile_context>
chip_gen: v6e
topology: v6e:2x2x1
jax: 0.10.0
libtpu: 0.0.40
codegen_flags: <defaults>
</compile_context>

<pallas_src>
import functools
import math

import jax
import jax.numpy as jnp
from jax.experimental import pallas as pl
from jax.experimental.pallas import tpu as pltpu

_LANE = 128     # lane width: MXU-facing output feature dims padded to this
_SUBLANE = 8    # f32 sublane: batch tiles and the streamed state dim padded to this


def _round_up(n, m):
    return ((n + m - 1) // m) * m


def _cdiv(a, b):
    return -(-a // b)


def _qnetwork_kernel(*refs, num_hidden):
    """Fused MLP forward for one batch tile.

    refs = (x, w_in, b_in, [w_h_0, b_h_0, ..., w_h_{n-1}, b_h_{n-1}], w_out, b_out, out)
    Weights are bf16 (MXU operands); biases/accumulation/elementwise in f32; inter-layer
    activations carried in bf16 (same numerics as casting at the next dot, half the
    intermediate vld/vst traffic on v6e/v7x).
    """
    x_ref = refs[0]
    w_in_ref, b_in_ref = refs[1], refs[2]
    hidden_refs = refs[3:3 + 2 * num_hidden]
    w_out_ref = refs[3 + 2 * num_hidden]
    b_out_ref = refs[4 + 2 * num_hidden]
    out_ref = refs[5 + 2 * num_hidden]

    def layer(h_bf16, w_ref, b_ref):
        acc = jnp.dot(h_bf16, w_ref[...], preferred_element_type=jnp.float32)
        # bias add + ReLU in f32 (v5e VPU has no bf16), carry result forward as bf16.
        return jnp.maximum(acc + b_ref[...], 0.0).astype(jnp.bfloat16)

    h = layer(x_ref[...].astype(jnp.bfloat16), w_in_ref, b_in_ref)
    for i in range(num_hidden):  # statically unrolled
        h = layer(h, hidden_refs[2 * i], hidden_refs[2 * i + 1])

    out = jnp.dot(h, w_out_ref[...], preferred_element_type=jnp.float32) + b_out_ref[...]
    out_ref[...] = out.astype(out_ref.dtype)


def prepare_params(params):
    """Pad feature dims and cast weights to bf16.

    * w_in: input (state) dim padded only to a multiple of 8 — padding it to 128 would
      inflate HBM traffic of the only streamed operand (x) for small state sizes.
    * All output feature dims padded to multiples of 128 (lane-dense MXU tiles/stores).
    * Biases stay f32 and are reshaped to (1, F_pad).
    Zero padding is exact through ReLU and the matmuls.
    """
    w_in, b_in, w_hs, b_hs, w_out, b_out = params

    def pad_w(w, in_mult):
        fi, fo = w.shape
        w = jnp.pad(w, ((0, _round_up(fi, in_mult) - fi),
                        (0, _round_up(fo, _LANE) - fo)))
        return w.astype(jnp.bfloat16)

    def pad_b(b):
        f = b.shape[-1]
        b = jnp.pad(b.reshape(1, -1), ((0, 0), (0, _round_up(f, _LANE) - f)))
        return b.astype(jnp.float32)

    flat = [pad_w(w_in, _SUBLANE), pad_b(b_in)]
    for w, b in zip(w_hs, b_hs):
        flat.extend([pad_w(w, _LANE), pad_b(b)])
    flat.extend([pad_w(w_out, _LANE), pad_b(b_out)])
    return tuple(flat)


def qnetwork_forward(x, flat_params, *, num_hidden, action_size, batch_tile=None,
                     slice_output=True):
    """x: (B, state_size) f32. flat_params: output of prepare_params.

    Returns (B, action_size) f32, or the padded lane-dense (B_pad, A_pad) block when
    slice_output=False (lets the caller fuse e.g. argmax and skip an extra copy).
    """
    B, S = x.shape
    w_in = flat_params[0]
    w_out = flat_params[-2]
    S_pad, H_pad = w_in.shape
    A_pad = w_out.shape[1]

    # Batch tiling: large balanced tiles amortize the ~0.35 us per-grid-step overhead;
    # keep >=2 grid steps when B allows so v7x's second TensorCore participates; balance
    # the tile size so tail padding stays under one sublane group.
    TB_MAX = 512
    if batch_tile is None:
        steps = _cdiv(B, TB_MAX)
        if B >= 2 * _SUBLANE:
            steps = max(steps, 2)
        TB = _round_up(_cdiv(B, steps), _SUBLANE)
    else:
        TB = _round_up(batch_tile, _SUBLANE)
    steps = _cdiv(B, TB)
    B_pad = steps * TB

    x_p = x
    if (B_pad, S_pad) != (B, S):
        x_p = jnp.pad(x, ((0, B_pad - B), (0, S_pad - S)))

    kernel = functools.partial(_qnetwork_kernel, num_hidden=num_hidden)

    # Activations stream over the batch grid; weight/bias specs return the same block
    # every step -> DMA'd once, VMEM-resident across the grid.
    x_spec = pl.BlockSpec((TB, S_pad), lambda i: (i, 0))
    out_spec = pl.BlockSpec((TB, A_pad), lambda i: (i, 0))

    param_bytes = sum(int(p.size) * p.dtype.itemsize for p in flat_params)
    stream_bytes = 2 * (TB * S_pad * 4 + TB * A_pad * 4)   # double-buffered x / out tiles
    inter_bytes = 2 * TB * H_pad * 4                       # intermediate activation slack

    flops = 2 * B_pad * (S_pad * H_pad + num_hidden * H_pad * H_pad + H_pad * A_pad)
    bytes_accessed = int(x_p.size) * 4 + param_bytes + B_pad * A_pad * 4

    # TODO(synk): for hidden stacks whose resident weights exceed ~40-48 MiB on v7x
    # (64 MiB VMEM/TC), switch hidden weights to memory_space=pl.ANY and stream them per
    # layer with pltpu.emit_pipeline / make_async_copy instead of keeping all resident.

    out_padded = None
    err = None
    # Primary path: single-buffer the constant-index weight/bias specs (Buffered(1)) —
    # halves resident-weight VMEM.  Fall back to default double-buffering only if this
    # jax build rejects buffer_count=1 on top-level pallas_call specs.
    for buffer_count in (1, 2):
        if buffer_count == 1:
            param_specs = [pl.BlockSpec(p.shape, lambda i: (0, 0),
                                        pipeline_mode=pl.Buffered(1))
                           for p in flat_params]
        else:
            param_specs = [pl.BlockSpec(p.shape, lambda i: (0, 0)) for p in flat_params]

        needed = buffer_count * param_bytes + stream_bytes + inter_bytes
        vmem_limit = min(64 * 1024 * 1024,                 # v7x physical VMEM per TC
                         max(32 * 1024 * 1024,             # never below scoped default
                             int(needed * 3 // 2)))        # ~50% headroom

        call = pl.pallas_call(
            kernel,
            out_shape=jax.ShapeDtypeStruct((B_pad, A_pad), jnp.float32),
            grid=(steps,),
            in_specs=[x_spec, *param_specs],
            out_specs=out_spec,
            compiler_params=pltpu.CompilerParams(
                dimension_semantics=("parallel",),
                vmem_limit_bytes=vmem_limit),
            cost_estimate=pl.CostEstimate(
                flops=flops, transcendentals=0, bytes_accessed=bytes_accessed),
        )
        try:
            out_padded = call(x_p, *flat_params)
            break
        except Exception as e:  # noqa: BLE001 — retry with default double-buffering
            err = e
    if out_padded is None:
        raise err

    if not slice_output:
        return out_padded
    return out_padded[:B, :action_size]


def init_params(key, state_size, action_size, hidden_size, num_layers):
    """Deterministic init mimicking nn.Linear's U(-1/sqrt(fan_in), 1/sqrt(fan_in)).
    Weights stored as (in_features, out_features); biases as (out_features,)."""
    num_hidden = num_layers - 1

    def linear(k, fan_in, fan_out):
        kw, kb = jax.random.split(k)
        bound = 1.0 / math.sqrt(fan_in)
        w = jax.random.uniform(kw, (fan_in, fan_out), jnp.float32, -bound, bound)
        b = jax.random.uniform(kb, (fan_out,), jnp.float32, -bound, bound)
        return w, b

    keys = jax.random.split(key, num_hidden + 2)
    w_in, b_in = linear(keys[0], state_size, hidden_size)
    w_hs, b_hs = [], []
    for i in range(num_hidden):
        w, b = linear(keys[1 + i], hidden_size, hidden_size)
        w_hs.append(w)
        b_hs.append(b)
    w_out, b_out = linear(keys[-1], hidden_size, action_size)
    return (w_in, b_in, w_hs, b_hs, w_out, b_out)


def reference_forward_bf16(x, params):
    """Reference matching the kernel's numerics (bf16 matmul operands, f32 accumulate)."""
    w_in, b_in, w_hs, b_hs, w_out, b_out = params

    def mm(a, w):
        return jnp.dot(a.astype(jnp.bfloat16), w.astype(jnp.bfloat16),
                       preferred_element_type=jnp.float32)

    h = jnp.maximum(mm(x, w_in) + b_in, 0.0)
    for w, b in zip(w_hs, b_hs):
        h = jnp.maximum(mm(h, w) + b, 0.0)
    return mm(h, w_out) + b_out


def reference_forward_f32(x, params):
    w_in, b_in, w_hs, b_hs, w_out, b_out = params
    h = jnp.maximum(x @ w_in + b_in, 0.0)
    for w, b in zip(w_hs, b_hs):
        h = jnp.maximum(h @ w + b, 0.0)
    return h @ w_out + b_out


if __name__ == "__main__":
    state_size = 16
    action_size = 8
    hidden_size = 64

    key = jax.random.PRNGKey(0)
    kx1, kx2, kp1, kp2 = jax.random.split(key, 4)

    # (batch, num_layers) cases: exercises single-step grid, multi-step grid with batch
    # tail padding, the one-hidden-layer path, and the no-hidden-layer path.
    cases = [(8, 2, kx1, kp1), (24, 2, kx2, kp1), (8, 1, kx1, kp2)]

    for batch, num_layers, kx, kp in cases:
        num_hidden = num_layers - 1
        x = jax.random.normal(kx, (batch, state_size), jnp.float32)
        params = init_params(kp, state_size, action_size, hidden_size, num_layers)
        flat = prepare_params(params)

        out = qnetwork_forward(x, flat, num_hidden=num_hidden, action_size=action_size)
        out = jax.block_until_ready(out)
        assert out.shape == (batch, action_size)

        ref_bf16 = reference_forward_bf16(x, params)
        ref_f32 = reference_forward_f32(x, params)
        assert jnp.allclose(out, ref_bf16, atol=1e-3, rtol=1e-3), \
            f"mismatch vs bf16-emulating reference (batch={batch}, num_layers={num_layers})"
        assert jnp.allclose(out, ref_f32, atol=5e-2, rtol=5e-2), \
            f"mismatch vs f32 reference (batch={batch}, num_layers={num_layers})"

    print("KERNEL_OK")
</pallas_src>

<mosaic_0001>
module attributes {stable_mosaic.version = 11 : i64} {
  func.func @_qnetwork_kernel(%arg0: i32, %arg1: memref<8x16xf32, #tpu.memory_space<vmem>>, %arg2: memref<16x128xbf16, #tpu.memory_space<vmem>>, %arg3: memref<1x128xf32, #tpu.memory_space<vmem>>, %arg4: memref<128x128xbf16, #tpu.memory_space<vmem>>, %arg5: memref<1x128xf32, #tpu.memory_space<vmem>>, %arg6: memref<128x128xbf16, #tpu.memory_space<vmem>>, %arg7: memref<1x128xf32, #tpu.memory_space<vmem>>, %arg8: memref<8x128xf32, #tpu.memory_space<vmem>>) attributes {dimension_semantics = [#tpu.dimension_semantics<parallel>], iteration_bounds = array<i64: 1>, scalar_prefetch = 0 : i64, scratch_operands = 0 : i64, tpu.core_type = #tpu.core_type<tc>, window_params = [{transform_indices = @transform_0, window_bounds = array<i64: 8, 16>}, {pipeline_mode = #tpu.pipeline_mode<synchronous>, transform_indices = @transform_1, window_bounds = array<i64: 16, 128>}, {pipeline_mode = #tpu.pipeline_mode<synchronous>, transform_indices = @transform_2, window_bounds = array<i64: 1, 128>}, {pipeline_mode = #tpu.pipeline_mode<synchronous>, transform_indices = @transform_3, window_bounds = array<i64: 128, 128>}, {pipeline_mode = #tpu.pipeline_mode<synchronous>, transform_indices = @transform_4, window_bounds = array<i64: 1, 128>}, {pipeline_mode = #tpu.pipeline_mode<synchronous>, transform_indices = @transform_5, window_bounds = array<i64: 128, 128>}, {pipeline_mode = #tpu.pipeline_mode<synchronous>, transform_indices = @transform_6, window_bounds = array<i64: 1, 128>}, {transform_indices = @transform_7, window_bounds = array<i64: 8, 128>}]} {
    %c0 = arith.constant 0 : index
    %c0_0 = arith.constant 0 : index
    %0 = vector.load %arg1[%c0, %c0_0] : memref<8x16xf32, #tpu.memory_space<vmem>>, vector<8x16xf32>
    %1 = arith.truncf %0 : vector<8x16xf32> to vector<8x16xbf16>
    %c0_1 = arith.constant 0 : index
    %c0_2 = arith.constant 0 : index
    %2 = vector.load %arg2[%c0_1, %c0_2] : memref<16x128xbf16, #tpu.memory_space<vmem>>, vector<16x128xbf16>
    %cst = arith.constant dense<0.000000e+00> : vector<8x128xf32>
    %3 = tpu.matmul %1, %2, %cst {dimension_numbers = #tpu.dot_dimension_numbers<[1], [0], [0], [1], [0, 0, 1, 1], [], []>} : vector<8x16xbf16>, vector<16x128xbf16>, vector<8x128xf32> -> vector<8x128xf32>
    %c0_3 = arith.constant 0 : index
    %c0_4 = arith.constant 0 : index
    %4 = vector.load %arg3[%c0_3, %c0_4] : memref<1x128xf32, #tpu.memory_space<vmem>>, vector<1x128xf32>
    %5 = vector.broadcast %4 : vector<1x128xf32> to vector<8x128xf32>
    %6 = arith.addf %3, %5 : vector<8x128xf32>
    %cst_5 = arith.constant 0.000000e+00 : f32
    %7 = vector.broadcast %cst_5 : f32 to vector<8x128xf32>
    %8 = arith.maximumf %6, %7 : vector<8x128xf32>
    %9 = arith.truncf %8 : vector<8x128xf32> to vector<8x128xbf16>
    %c0_6 = arith.constant 0 : index
    %c0_7 = arith.constant 0 : index
    %10 = vector.load %arg4[%c0_6, %c0_7] : memref<128x128xbf16, #tpu.memory_space<vmem>>, vector<128x128xbf16>
    %cst_8 = arith.constant dense<0.000000e+00> : vector<8x128xf32>
    %11 = tpu.matmul %9, %10, %cst_8 {dimension_numbers = #tpu.dot_dimension_numbers<[1], [0], [0], [1], [0, 0, 1, 1], [], []>} : vector<8x128xbf16>, vector<128x128xbf16>, vector<8x128xf32> -> vector<8x128xf32>
    %c0_9 = arith.constant 0 : index
    %c0_10 = arith.constant 0 : index
    %12 = vector.load %arg5[%c0_9, %c0_10] : memref<1x128xf32, #tpu.memory_space<vmem>>, vector<1x128xf32>
    %13 = vector.broadcast %12 : vector<1x128xf32> to vector<8x128xf32>
    %14 = arith.addf %11, %13 : vector<8x128xf32>
    %cst_11 = arith.constant 0.000000e+00 : f32
    %15 = vector.broadcast %cst_11 : f32 to vector<8x128xf32>
    %16 = arith.maximumf %14, %15 : vector<8x128xf32>
    %17 = arith.truncf %16 : vector<8x128xf32> to vector<8x128xbf16>
    %c0_12 = arith.constant 0 : index
    %c0_13 = arith.constant 0 : index
    %18 = vector.load %arg6[%c0_12, %c0_13] : memref<128x128xbf16, #tpu.memory_space<vmem>>, vector<128x128xbf16>
    %cst_14 = arith.constant dense<0.000000e+00> : vector<8x128xf32>
    %19 = tpu.matmul %17, %18, %cst_14 {dimension_numbers = #tpu.dot_dimension_numbers<[1], [0], [0], [1], [0, 0, 1, 1], [], []>} : vector<8x128xbf16>, vector<128x128xbf16>, vector<8x128xf32> -> vector<8x128xf32>
    %c0_15 = arith.constant 0 : index
    %c0_16 = arith.constant 0 : index
    %20 = vector.load %arg7[%c0_15, %c0_16] : memref<1x128xf32, #tpu.memory_space<vmem>>, vector<1x128xf32>
    %21 = vector.broadcast %20 : vector<1x128xf32> to vector<8x128xf32>
    %22 = arith.addf %19, %21 : vector<8x128xf32>
    %c0_17 = arith.constant 0 : index
    %c0_18 = arith.constant 0 : index
    %23 = vector.load %arg8[%c0_17, %c0_18] : memref<8x128xf32, #tpu.memory_space<vmem>>, vector<8x128xf32>
    tpu.vector_store %arg8[%c0_17, %c0_18], %22 {strides = array<i32>} : memref<8x128xf32, #tpu.memory_space<vmem>>, vector<8x128xf32>,
    return
  }
  func.func @transform_0(%arg0: i32) -> (i32, i32) {
    %c0_i32 = arith.constant 0 : i32
    %c0_i32_0 = arith.constant 0 : i32
    return %arg0, %c0_i32 : i32, i32
  }
  func.func @transform_1(%arg0: i32) -> (i32, i32) {
    %c0_i32 = arith.constant 0 : i32
    %c0_i32_0 = arith.constant 0 : i32
    %c0_i32_1 = arith.constant 0 : i32
    return %c0_i32, %c0_i32_0 : i32, i32
  }
  func.func @transform_2(%arg0: i32) -> (i32, i32) {
    %c0_i32 = arith.constant 0 : i32
    %c0_i32_0 = arith.constant 0 : i32
    %c0_i32_1 = arith.constant 0 : i32
    return %c0_i32, %c0_i32_0 : i32, i32
  }
  func.func @transform_3(%arg0: i32) -> (i32, i32) {
    %c0_i32 = arith.constant 0 : i32
    %c0_i32_0 = arith.constant 0 : i32
    %c0_i32_1 = arith.constant 0 : i32
    return %c0_i32, %c0_i32_0 : i32, i32
  }
  func.func @transform_4(%arg0: i32) -> (i32, i32) {
    %c0_i32 = arith.constant 0 : i32
    %c0_i32_0 = arith.constant 0 : i32
    %c0_i32_1 = arith.constant 0 : i32
    return %c0_i32, %c0_i32_0 : i32, i32
  }
  func.func @transform_5(%arg0: i32) -> (i32, i32) {
    %c0_i32 = arith.constant 0 : i32
    %c0_i32_0 = arith.constant 0 : i32
    %c0_i32_1 = arith.constant 0 : i32
    return %c0_i32, %c0_i32_0 : i32, i32
  }
  func.func @transform_6(%arg0: i32) -> (i32, i32) {
    %c0_i32 = arith.constant 0 : i32
    %c0_i32_0 = arith.constant 0 : i32
    %c0_i32_1 = arith.constant 0 : i32
    return %c0_i32, %c0_i32_0 : i32, i32
  }
  func.func @transform_7(%arg0: i32) -> (i32, i32) {
    %c0_i32 = arith.constant 0 : i32
    %c0_i32_0 = arith.constant 0 : i32
    return %arg0, %c0_i32 : i32, i32
  }
}

module attributes {stable_mosaic.version = 11 : i64} {
  func.func @_qnetwork_kernel(%arg0: i32, %arg1: memref<8x16xf32, #tpu.memory_space<vmem>>, %arg2: memref<16x128xbf16, #tpu.memory_space<vmem>>, %arg3: memref<1x128xf32, #tpu.memory_space<vmem>>, %arg4: memref<128x128xbf16, #tpu.memory_space<vmem>>, %arg5: memref<1x128xf32, #tpu.memory_space<vmem>>, %arg6: memref<128x128xbf16, #tpu.memory_space<vmem>>, %arg7: memref<1x128xf32, #tpu.memory_space<vmem>>, %arg8: memref<8x128xf32, #tpu.memory_space<vmem>>) attributes {dimension_semantics = [#tpu.dimension_semantics<parallel>], iteration_bounds = array<i64: 1>, scalar_prefetch = 0 : i64, scratch_operands = 0 : i64, tpu.core_type = #tpu.core_type<tc>, window_params = [{transform_indices = @transform_0, window_bounds = array<i64: 8, 16>}, {pipeline_mode = #tpu.pipeline_mode<synchronous>, transform_indices = @transform_1, window_bounds = array<i64: 16, 128>}, {pipeline_mode = #tpu.pipeline_mode<synchronous>, transform_indices = @transform_2, window_bounds = array<i64: 1, 128>}, {pipeline_mode = #tpu.pipeline_mode<synchronous>, transform_indices = @transform_3, window_bounds = array<i64: 128, 128>}, {pipeline_mode = #tpu.pipeline_mode<synchronous>, transform_indices = @transform_4, window_bounds = array<i64: 1, 128>}, {pipeline_mode = #tpu.pipeline_mode<synchronous>, transform_indices = @transform_5, window_bounds = array<i64: 128, 128>}, {pipeline_mode = #tpu.pipeline_mode<synchronous>, transform_indices = @transform_6, window_bounds = array<i64: 1, 128>}, {transform_indices = @transform_7, window_bounds = array<i64: 8, 128>}]} {
    %c0 = arith.constant 0 : index
    %c0_0 = arith.constant 0 : index
    %0 = vector.load %arg1[%c0, %c0_0] : memref<8x16xf32, #tpu.memory_space<vmem>>, vector<8x16xf32>
    %1 = arith.truncf %0 : vector<8x16xf32> to vector<8x16xbf16>
    %c0_1 = arith.constant 0 : index
    %c0_2 = arith.constant 0 : index
    %2 = vector.load %arg2[%c0_1, %c0_2] : memref<16x128xbf16, #tpu.memory_space<vmem>>, vector<16x128xbf16>
    %cst = arith.constant dense<0.000000e+00> : vector<8x128xf32>
    %3 = tpu.matmul %1, %2, %cst {dimension_numbers = #tpu.dot_dimension_numbers<[1], [0], [0], [1], [0, 0, 1, 1], [], []>} : vector<8x16xbf16>, vector<16x128xbf16>, vector<8x128xf32> -> vector<8x128xf32>
    %c0_3 = arith.constant 0 : index
    %c0_4 = arith.constant 0 : index
    %4 = vector.load %arg3[%c0_3, %c0_4] : memref<1x128xf32, #tpu.memory_space<vmem>>, vector<1x128xf32>
    %5 = vector.broadcast %4 : vector<1x128xf32> to vector<8x128xf32>
    %6 = arith.addf %3, %5 : vector<8x128xf32>
    %cst_5 = arith.constant 0.000000e+00 : f32
    %7 = vector.broadcast %cst_5 : f32 to vector<8x128xf32>
    %8 = arith.maximumf %6, %7 : vector<8x128xf32>
    %9 = arith.truncf %8 : vector<8x128xf32> to vector<8x128xbf16>
    %c0_6 = arith.constant 0 : index
    %c0_7 = arith.constant 0 : index
    %10 = vector.load %arg4[%c0_6, %c0_7] : memref<128x128xbf16, #tpu.memory_space<vmem>>, vector<128x128xbf16>
    %cst_8 = arith.constant dense<0.000000e+00> : vector<8x128xf32>
    %11 = tpu.matmul %9, %10, %cst_8 {dimension_numbers = #tpu.dot_dimension_numbers<[1], [0], [0], [1], [0, 0, 1, 1], [], []>} : vector<8x128xbf16>, vector<128x128xbf16>, vector<8x128xf32> -> vector<8x128xf32>
    %c0_9 = arith.constant 0 : index
    %c0_10 = arith.constant 0 : index
    %12 = vector.load %arg5[%c0_9, %c0_10] : memref<1x128xf32, #tpu.memory_space<vmem>>, vector<1x128xf32>
    %13 = vector.broadcast %12 : vector<1x128xf32> to vector<8x128xf32>
    %14 = arith.addf %11, %13 : vector<8x128xf32>
    %cst_11 = arith.constant 0.000000e+00 : f32
    %15 = vector.broadcast %cst_11 : f32 to vector<8x128xf32>
    %16 = arith.maximumf %14, %15 : vector<8x128xf32>
    %17 = arith.truncf %16 : vector<8x128xf32> to vector<8x128xbf16>
    %c0_12 = arith.constant 0 : index
    %c0_13 = arith.constant 0 : index
    %18 = vector.load %arg6[%c0_12, %c0_13] : memref<128x128xbf16, #tpu.memory_space<vmem>>, vector<128x128xbf16>
    %cst_14 = arith.constant dense<0.000000e+00> : vector<8x128xf32>
    %19 = tpu.matmul %17, %18, %cst_14 {dimension_numbers = #tpu.dot_dimension_numbers<[1], [0], [0], [1], [0, 0, 1, 1], [], []>} : vector<8x128xbf16>, vector<128x128xbf16>, vector<8x128xf32> -> vector<8x128xf32>
    %c0_15 = arith.constant 0 : index
    %c0_16 = arith.constant 0 : index
    %20 = vector.load %arg7[%c0_15, %c0_16] : memref<1x128xf32, #tpu.memory_space<vmem>>, vector<1x128xf32>
    %21 = vector.broadcast %20 : vector<1x128xf32> to vector<8x128xf32>
    %22 = arith.addf %19, %21 : vector<8x128xf32>
    %c0_17 = arith.constant 0 : index
    %c0_18 = arith.constant 0 : index
    %23 = vector.load %arg8[%c0_17, %c0_18] : memref<8x128xf32, #tpu.memory_space<vmem>>, vector<8x128xf32>
    tpu.vector_store %arg8[%c0_17, %c0_18], %22 {strides = array<i32>} : memref<8x128xf32, #tpu.memory_space<vmem>>, vector<8x128xf32>,
    return
  }
  func.func @transform_0(%arg0: i32) -> (i32, i32) {
    %c0_i32 = arith.constant 0 : i32
    %c0_i32_0 = arith.constant 0 : i32
    return %arg0, %c0_i32 : i32, i32
  }
  func.func @transform_1(%arg0: i32) -> (i32, i32) {
    %c0_i32 = arith.constant 0 : i32
    %c0_i32_0 = arith.constant 0 : i32
    %c0_i32_1 = arith.constant 0 : i32
    return %c0_i32, %c0_i32_0 : i32, i32
  }
  func.func @transform_2(%arg0: i32) -> (i32, i32) {
    %c0_i32 = arith.constant 0 : i32
    %c0_i32_0 = arith.constant 0 : i32
    %c0_i32_1 = arith.constant 0 : i32
    return %c0_i32, %c0_i32_0 : i32, i32
  }
  func.func @transform_3(%arg0: i32) -> (i32, i32) {
    %c0_i32 = arith.constant 0 : i32
    %c0_i32_0 = arith.constant 0 : i32
    %c0_i32_1 = arith.constant 0 : i32
    return %c0_i32, %c0_i32_0 : i32, i32
  }
  func.func @transform_4(%arg0: i32) -> (i32, i32) {
    %c0_i32 = arith.constant 0 : i32
    %c0_i32_0 = arith.constant 0 : i32
    %c0_i32_1 = arith.constant 0 : i32
    return %c0_i32, %c0_i32_0 : i32, i32
  }
  func.func @transform_5(%arg0: i32) -> (i32, i32) {
    %c0_i32 = arith.constant 0 : i32
    %c0_i32_0 = arith.constant 0 : i32
    %c0_i32_1 = arith.constant 0 : i32
    return %c0_i32, %c0_i32_0 : i32, i32
  }
  func.func @transform_6(%arg0: i32) -> (i32, i32) {
    %c0_i32 = arith.constant 0 : i32
    %c0_i32_0 = arith.constant 0 : i32
    %c0_i32_1 = arith.constant 0 : i32
    return %c0_i32, %c0_i32_0 : i32, i32
  }
  func.func @transform_7(%arg0: i32) -> (i32, i32) {
    %c0_i32 = arith.constant 0 : i32
    %c0_i32_0 = arith.constant 0 : i32
    return %arg0, %c0_i32 : i32, i32
  }
}

</mosaic_0001>

<bundles_post_ra>
// kernel: tpu_custom_call.1
= control target key start
LH: loop header
LB: loop body
LE: loop exit
PB: predicated region body
PF: predicated region fallthrough
CT: control target
= control target key end

     0   :  { %12 = vsyncpa [#allocation3], 0  ;;  %s709_s0 = inlined_call_operand.hbm [shape: f32[8,16], index: 0, kind: input, shape index: {}]   ;;  %s710_s1 = inlined_call_operand.hbm [shape: bf16[16,128], index: 1, kind: input, shape index: {}]   ;;  %s711_s2 = inlined_call_operand.vmem [shape: f32[1,128], index: 2, kind: input, shape index: {}]   ;;  %s712_s3 = inlined_call_operand.hbm [shape: bf16[128,128], index: 3, kind: input, shape index: {}]   ;;  %s713_s4 = inlined_call_operand.vmem [shape: f32[1,128], index: 4, kind: input, shape index: {}]   ;;  %s714_s5 = inlined_call_operand.hbm [shape: bf16[128,128], index: 5, kind: input, shape index: {}]   ;;  %s715_s6 = inlined_call_operand.vmem [shape: f32[1,128], index: 6, kind: input, shape index: {}]   ;;  %s716_s7 = inlined_call_operand.hbm [shape: f32[8,128], index: 7, kind: output, shape index: {}]  }
   0x1   :  { %13 = vsyncpa [#allocation6], 0 }
   0x2   :  { %14 = vsyncpa [#allocation9], 0 }
   0x3   :  { %15 = vsyncpa [#allocation4], 0  ;;  %s607_s24 = smov [#allocation5]  }
   0x4   :  { %s31_s25 = sshll.u32 %s607_s24, 4  ;;  %s32_s25 = int_to_ptr.vmem [resolvable:$true] %s31_s25 }
   0x5   :  { %s507_s26 = scalar_lea.vmem %s32_s25, 128  ;;  %p512_p1 = scmp.lt.s32.totalorder %s32_s25, %s32_s25 }
   0x6   :  { %p508_p0 = scmp.ne.s32.totalorder %s32_s25, %s507_s26  ;;  %p513_p2 = scmp.lt.s32.totalorder %s507_s26, %s507_s26 }
   0x8   :  { %p514_p3 = por %p513_p2, %p512_p1 }
   0xa   :  { %p515_p4 = pnand %p514_p3, %p508_p0 }
   0xc   :  { %518 = shalt.err (!%p515_p4)
}
   0xd   :  { %s608_s27 = smov 64   ;;  %s609_s28 = smov 4  }
   0xe   :  { %37 = dma.hbm_to_vmem [thread:$0]  %s710_s1, 128, %s32_s25, [#allocation6], %s608_s27, %s608_s27, %s609_s28  }
   0xf   :  { %s610_s8 = smov [#allocation2]   ;;  %s611_s10 = smov [#allocation7]  }
  0x10   :  { %s22_s9 = sshll.u32 %s610_s8, 4  ;;  %s45_s11 = sshll.u32 %s611_s10, 4  ;;  %s23_s9 = int_to_ptr.vmem [resolvable:$true] %s22_s9  ;;  %s46_s11 = int_to_ptr.vmem [resolvable:$true] %s45_s11 }
  0x11   :  { %s527_s12 = scalar_lea.vmem %s23_s9, 128  ;;  %p532_p6 = scmp.lt.s32.totalorder %s23_s9, %s23_s9 }
  0x12   :  { %p528_p5 = scmp.ne.s32.totalorder %s23_s9, %s527_s12  ;;  %p533_p7 = scmp.lt.s32.totalorder %s527_s12, %s527_s12 }
  0x14   :  { %p534_p8 = por %p533_p7, %p532_p6 }
  0x16   :  { %p535_p9 = pnand %p534_p8, %p528_p5 }
  0x18   :  { %538 = shalt.err (!%p535_p9)
}
  0x19   :  { %25 = dma.hbm_to_vmem [thread:$0]  %s709_s0, 128, %s23_s9, [#allocation3]  }
  0x1a   :  { %s547_s15 = scalar_lea.vmem %s46_s11, 1024  ;;  %p552_p11 = scmp.lt.s32.totalorder %s46_s11, %s46_s11 }
  0x1b   :  { %p548_p10 = scmp.ne.s32.totalorder %s46_s11, %s547_s15  ;;  %p553_p12 = scmp.lt.s32.totalorder %s547_s15, %s547_s15 }
  0x1d   :  { %p554_p13 = por %p553_p12, %p552_p11 }
  0x1f   :  { %p555_p0 = pnand %p554_p13, %p548_p10 }
  0x21   :  { %558 = shalt.err (!%p555_p0)
}
  0x22   :  { %51 = dma.hbm_to_vmem [thread:$0]  %s712_s3, 1024, %s46_s11, [#allocation6], %s608_s27, %s608_s27, %s609_s28  }
  0x23   :  { %s612_s17 = smov [#allocation8]  }
  0x24   :  { %s59_s18 = sshll.u32 %s612_s17, 4  ;;  %s60_s18 = int_to_ptr.vmem [resolvable:$true] %s59_s18 }
  0x25   :  { %s567_s19 = scalar_lea.vmem %s60_s18, 1024  ;;  %p572_p2 = scmp.lt.s32.totalorder %s60_s18, %s60_s18 }
  0x26   :  { %p568_p1 = scmp.ne.s32.totalorder %s60_s18, %s567_s19  ;;  %p573_p3 = scmp.lt.s32.totalorder %s567_s19, %s567_s19 }
  0x28   :  { %p574_p4 = por %p573_p3, %p572_p2 }
  0x2a   :  { %p575_p5 = pnand %p574_p4, %p568_p1 }
  0x2c   :  { %578 = shalt.err (!%p575_p5)
}
  0x2d   :  { %65 = dma.hbm_to_vmem [thread:$0]  %s714_s5, 1024, %s60_s18, [#allocation9], %s608_s27, %s608_s27, %s609_s28  }
  0x2e   :  { %599 = dma.done.wait [#allocation3], 128  }
  0x2f   :  { %600 = vsyncadd [#allocation3], 4294967168 }
  0x30   :  { %601 = dma.done.wait [#allocation6], 1152  }
  0x31   :  { %602 = vsyncadd [#allocation6], 4294966144 }
  0x32   :  { %603 = dma.done.wait [#allocation9], 1024  }
  0x33   :  { %604 = vsyncadd [#allocation9], 4294966272  ;;  %v613_v0 = vmov 0.0   ;;  %vm614_vm0 = vmmov 0   ;;  %v482_v1 = vld [vmem:[#allocation5] sm:$0xff]   ;;  %v81_v2 = vld [vmem:[#allocation2] sm:$0xff] }
  0x34   :  { %427 = vmatprep.subr.bf16.mxu0 %v613_v0  ;;  %429 = vmatprep.mubr.msk.bf16.mxu0 %vm614_vm0, %v613_v0  ;;  %v82_v3 = vpack.c.bf16 %v81_v2, %v81_v2  ;;  %vm98_vm1 = vcmask 130048   ;;  %v483_v4 = vld [vmem:[#allocation7 + $0x38] sm:$0xff]   ;;  %v484_v5 = vld [vmem:[#allocation7 + $0x30] sm:$0xff]   ;;  %v485_v6 = vld [vmem:[#allocation7 + $0x28] sm:$0xff]   ;;  %s615_s24 = smov [#allocation10]  }
  0x35   :  { %433 = vmatprep.subr.bf16.mxu1 %v613_v0  ;;  %449 = vmatprep.mubr.msk.bf16.mxu1 %vm614_vm0, %v613_v0  ;;  %v486_v7 = vld [vmem:[#allocation7 + $0x20] sm:$0xff]   ;;  %v487_v8 = vld [vmem:[#allocation7 + $0x18] sm:$0xff]   ;;  %v488_v9 = vld [vmem:[#allocation7 + $0x10] sm:$0xff]   ;;  %s375_s25 = sshll.u32 %s615_s24, 4  ;;  %s376_s25 = int_to_ptr.vmem [resolvable:$true] %s375_s25 }
  0x36   :  { %428 = vmatpush3.bf16.msra.mxu0 %v482_v1  ;;  %434 = vmatpush3.bf16.msra.mxu1 %v483_v4  ;;  %v489_v10 = vld [vmem:[#allocation7 + $0x8] sm:$0xff]   ;;  %v490_v11 = vld [vmem:[#allocation7] sm:$0xff]   ;;  %v491_v12 = vld [vmem:[#allocation8 + $0x38] sm:$0xff]   ;;  %p584_p7 = scmp.lt.s32.totalorder %s376_s25, %s376_s25 }
  0x37   :  { %453 = vmatprep.subr.bf16.mxu0 %v613_v0  ;;  %435 = vmatprep.subr.bf16.mxu1 %v613_v0  ;;  %v492_v13 = vld [vmem:[#allocation8 + $0x30] sm:$0xff]   ;;  %v493_v14 = vld [vmem:[#allocation8 + $0x28] sm:$0xff]   ;;  %v494_v15 = vld [vmem:[#allocation8 + $0x20] sm:$0xff]  }
  0x38   :  { %v495_v16 = vld [vmem:[#allocation8 + $0x18] sm:$0xff]   ;;  %v496_v17 = vld [vmem:[#allocation8 + $0x10] sm:$0xff]   ;;  %v497_v26 = vld [vmem:[#allocation8 + $0x8] sm:$0xff]  }
  0x39   :  { %430 = vmatmul.mubr.msk.bf16.vlgmr.msra.gmra.mxu0 %vm98_vm1, %v82_v3  ;;  %v386_v18 = vld [vmem:[%s711_s2] ss:$0 sm:$0xff]  ;;  %v498_v27 = vld [vmem:[#allocation8] sm:$0xff]  }
  0x3a   :  { %469 = vmatprep.mubr.msk.bf16.mxu0 %vm614_vm0, %v613_v0  ;;  %436 = vmatpush3.bf16.msra.mxu1 %v484_v5  ;;  %v389_v28 = vld [vmem:[%s713_s4] ss:$0 sm:$0xff]  ;;  %s579_s4 = scalar_lea.vmem %s376_s25, 128 }
  0x3b   :  { %437 = vmatprep.subr.bf16.mxu1 %v613_v0  ;;  %454 = vmatpush3.bf16.msra.mxu0 %v491_v12  ;;  %v398_v36 = vld [vmem:[%s715_s6] ss:$0 sm:$0xff]  ;;  %p580_p6 = scmp.ne.s32.totalorder %s376_s25, %s579_s4  ;;  %p585_p8 = scmp.lt.s32.totalorder %s579_s4, %s579_s4 }
  0x3c   :  { %455 = vmatprep.subr.bf16.mxu0 %v613_v0 }
  0x3d   :  { %p586_p9 = por %p585_p8, %p584_p7 }
  0x3e   :  { %438 = vmatpush3.bf16.msra.mxu1 %v485_v6 }
  0x3f   :  { %439 = vmatprep.subr.bf16.mxu1 %v613_v0  ;;  %456 = vmatpush3.bf16.msra.mxu0 %v492_v13  ;;  %p587_p10 = pnand %p586_p9, %p580_p6 }
  0x40   :  { %457 = vmatprep.subr.bf16.mxu0 %v613_v0 }
  0x42   :  { %440 = vmatpush3.bf16.msra.mxu1 %v486_v7 }
  0x43   :  { %441 = vmatprep.subr.bf16.mxu1 %v613_v0  ;;  %458 = vmatpush3.bf16.msra.mxu0 %v493_v14 }
  0x44   :  { %459 = vmatprep.subr.bf16.mxu0 %v613_v0 }
  0x46   :  { %442 = vmatpush3.bf16.msra.mxu1 %v487_v8 }
  0x47   :  { %443 = vmatprep.subr.bf16.mxu1 %v613_v0  ;;  %460 = vmatpush3.bf16.msra.mxu0 %v494_v15 }
  0x48   :  { %461 = vmatprep.subr.bf16.mxu0 %v613_v0 }
  0x4a   :  { %444 = vmatpush3.bf16.msra.mxu1 %v488_v9 }
  0x4b   :  { %445 = vmatprep.subr.bf16.mxu1 %v613_v0  ;;  %462 = vmatpush3.bf16.msra.mxu0 %v495_v16 }
  0x4c   :  { %463 = vmatprep.subr.bf16.mxu0 %v613_v0 }
  0x4e   :  { %446 = vmatpush3.bf16.msra.mxu1 %v489_v10 }
  0x4f   :  { %447 = vmatprep.subr.bf16.mxu1 %v613_v0  ;;  %464 = vmatpush3.bf16.msra.mxu0 %v496_v17 }
  0x50   :  { %465 = vmatprep.subr.bf16.mxu0 %v613_v0 }
  0x52   :  { %448 = vmatpush3.bf16.msra.mxu1 %v490_v11 }
  0x53   :  { %466 = vmatpush3.bf16.msra.mxu0 %v497_v26 }
  0x54   :  { %467 = vmatprep.subr.bf16.mxu0 %v613_v0 }
  0x57   :  { %468 = vmatpush3.bf16.msra.mxu0 %v498_v27 }
  0xf9   :  { %v136_v19 = vpop.f32.mrf.mxu0 }
  0xfa   :  { %v137_v20 = vadd.f32 %v386_v18, %v136_v19 }
  0xfb   :  { %v431_v21 = vpop.f32.mrf.mxu0 }
  0xfc   :  { %v142_v22 = vmax.f32 %v137_v20, 0.0 }
  0xfd   :  { %v139_v23 = vpop.f32.mrf.mxu0 }
  0xfe   :  { %v143_v24 = vpack.c.bf16 %v142_v22, %v142_v22 }
  0xff   :  { %v432_v25 = vpop.f32.mrf.mxu0 }
 0x100   :  { %450 = vmatmul.mubr.bf16.vlgmr.msra.gmra.mxu1 %v143_v24 }
 0x1c0   :  { %v249_v29 = vpop.f32.mrf.mxu1 }
 0x1c1   :  { %v250_v30 = vadd.f32 %v389_v28, %v249_v29 }
 0x1c2   :  { %v451_v31 = vpop.f32.mrf.mxu1 }
 0x1c3   :  { %v255_v32 = vmax.f32 %v250_v30, 0.0 }
 0x1c4   :  { %v252_v33 = vpop.f32.mrf.mxu1 }
 0x1c5   :  { %v256_v34 = vpack.c.bf16 %v255_v32, %v255_v32 }
 0x1c6   :  { %v452_v35 = vpop.f32.mrf.mxu1 }
 0x1c7   :  { %470 = vmatmul.mubr.bf16.vlgmr.msra.gmra.mxu0 %v256_v34 }
 0x287   :  { %v362_v37 = vpop.f32.mrf.mxu0 }
 0x288   :  { %v363_v38 = vadd.f32 %v398_v36, %v362_v37 }
 0x289   :  { %v471_v39 = vpop.f32.mrf.mxu0 }
 0x28a   :  { %368 = vst [vmem:[#allocation10] sm:$0xff] %v363_v38 }
 0x28b   :  { %v365_v40 = vpop.f32.mrf.mxu0 }
 0x28c   :  { %590 = shalt.err (!%p587_p10)
}
 0x28d   :  { %378 = dma.vmem_to_hbm [thread:$0]  %s376_s25, 128, %s716_s7, [#allocation4]   ;;  %v472_v41 = vpop.f32.mrf.mxu0 }
 0x28e   :  { %605 = dma.done.wait [#allocation4], 128  }
 0x28f   :  { %606 = vsyncadd [#allocation4], 4294967168 }
 0x290   :  { %382 = vsyncpa [#allocation3], 1 }
 0x291   :  { %383 = vsyncpa [#allocation6], 1 }
 0x292   :  { %384 = vsyncpa [#allocation9], 1 }
 0x293   :  { %385 = vsyncpa [#allocation4], 1 }

// kernel: tpu_custom_call.1
= control target key start
LH: loop header
LB: loop body
LE: loop exit
PB: predicated region body
PF: predicated region fallthrough
CT: control target
= control target key end

     0   :  { %12 = vsyncpa [#allocation3], 0  ;;  %s709_s0 = inlined_call_operand.hbm [shape: f32[8,16], index: 0, kind: input, shape index: {}]   ;;  %s710_s1 = inlined_call_operand.hbm [shape: bf16[16,128], index: 1, kind: input, shape index: {}]   ;;  %s711_s2 = inlined_call_operand.vmem [shape: f32[1,128], index: 2, kind: input, shape index: {}]   ;;  %s712_s3 = inlined_call_operand.hbm [shape: bf16[128,128], index: 3, kind: input, shape index: {}]   ;;  %s713_s4 = inlined_call_operand.vmem [shape: f32[1,128], index: 4, kind: input, shape index: {}]   ;;  %s714_s5 = inlined_call_operand.hbm [shape: bf16[128,128], index: 5, kind: input, shape index: {}]   ;;  %s715_s6 = inlined_call_operand.vmem [shape: f32[1,128], index: 6, kind: input, shape index: {}]   ;;  %s716_s7 = inlined_call_operand.hbm [shape: f32[8,128], index: 7, kind: output, shape index: {}]  }
   0x1   :  { %13 = vsyncpa [#allocation6], 0 }
   0x2   :  { %14 = vsyncpa [#allocation9], 0 }
   0x3   :  { %15 = vsyncpa [#allocation4], 0  ;;  %s607_s24 = smov [#allocation5]  }
   0x4   :  { %s31_s25 = sshll.u32 %s607_s24, 4  ;;  %s32_s25 = int_to_ptr.vmem [resolvable:$true] %s31_s25 }
   0x5   :  { %s507_s26 = scalar_lea.vmem %s32_s25, 128  ;;  %p512_p1 = scmp.lt.s32.totalorder %s32_s25, %s32_s25 }
   0x6   :  { %p508_p0 = scmp.ne.s32.totalorder %s32_s25, %s507_s26  ;;  %p513_p2 = scmp.lt.s32.totalorder %s507_s26, %s507_s26 }
   0x8   :  { %p514_p3 = por %p513_p2, %p512_p1 }
   0xa   :  { %p515_p4 = pnand %p514_p3, %p508_p0 }
   0xc   :  { %518 = shalt.err (!%p515_p4)
}
   0xd   :  { %s608_s27 = smov 64   ;;  %s609_s28 = smov 4  }
   0xe   :  { %37 = dma.hbm_to_vmem [thread:$0]  %s710_s1, 128, %s32_s25, [#allocation6], %s608_s27, %s608_s27, %s609_s28  }
   0xf   :  { %s610_s8 = smov [#allocation2]   ;;  %s611_s10 = smov [#allocation7]  }
  0x10   :  { %s22_s9 = sshll.u32 %s610_s8, 4  ;;  %s45_s11 = sshll.u32 %s611_s10, 4  ;;  %s23_s9 = int_to_ptr.vmem [resolvable:$true] %s22_s9  ;;  %s46_s11 = int_to_ptr.vmem [resolvable:$true] %s45_s11 }
  0x11   :  { %s527_s12 = scalar_lea.vmem %s23_s9, 128  ;;  %p532_p6 = scmp.lt.s32.totalorder %s23_s9, %s23_s9 }
  0x12   :  { %p528_p5 = scmp.ne.s32.totalorder %s23_s9, %s527_s12  ;;  %p533_p7 = scmp.lt.s32.totalorder %s527_s12, %s527_s12 }
  0x14   :  { %p534_p8 = por %p533_p7, %p532_p6 }
  0x16   :  { %p535_p9 = pnand %p534_p8, %p528_p5 }
  0x18   :  { %538 = shalt.err (!%p535_p9)
}
  0x19   :  { %25 = dma.hbm_to_vmem [thread:$0]  %s709_s0, 128, %s23_s9, [#allocation3]  }
  0x1a   :  { %s547_s15 = scalar_lea.vmem %s46_s11, 1024  ;;  %p552_p11 = scmp.lt.s32.totalorder %s46_s11, %s46_s11 }
  0x1b   :  { %p548_p10 = scmp.ne.s32.totalorder %s46_s11, %s547_s15  ;;  %p553_p12 = scmp.lt.s32.totalorder %s547_s15, %s547_s15 }
  0x1d   :  { %p554_p13 = por %p553_p12, %p552_p11 }
  0x1f   :  { %p555_p0 = pnand %p554_p13, %p548_p10 }
  0x21   :  { %558 = shalt.err (!%p555_p0)
}
  0x22   :  { %51 = dma.hbm_to_vmem [thread:$0]  %s712_s3, 1024, %s46_s11, [#allocation6], %s608_s27, %s608_s27, %s609_s28  }
  0x23   :  { %s612_s17 = smov [#allocation8]  }
  0x24   :  { %s59_s18 = sshll.u32 %s612_s17, 4  ;;  %s60_s18 = int_to_ptr.vmem [resolvable:$true] %s59_s18 }
  0x25   :  { %s567_s19 = scalar_lea.vmem %s60_s18, 1024  ;;  %p572_p2 = scmp.lt.s32.totalorder %s60_s18, %s60_s18 }
  0x26   :  { %p568_p1 = scmp.ne.s32.totalorder %s60_s18, %s567_s19  ;;  %p573_p3 = scmp.lt.s32.totalorder %s567_s19, %s567_s19 }
  0x28   :  { %p574_p4 = por %p573_p3, %p572_p2 }
  0x2a   :  { %p575_p5 = pnand %p574_p4, %p568_p1 }
  0x2c   :  { %578 = shalt.err (!%p575_p5)
}
  0x2d   :  { %65 = dma.hbm_to_vmem [thread:$0]  %s714_s5, 1024, %s60_s18, [#allocation9], %s608_s27, %s608_s27, %s609_s28  }
  0x2e   :  { %599 = dma.done.wait [#allocation3], 128  }
  0x2f   :  { %600 = vsyncadd [#allocation3], 4294967168 }
  0x30   :  { %601 = dma.done.wait [#allocation6], 1152  }
  0x31   :  { %602 = vsyncadd [#allocation6], 4294966144 }
  0x32   :  { %603 = dma.done.wait [#allocation9], 1024  }
  0x33   :  { %604 = vsyncadd [#allocation9], 4294966272  ;;  %v613_v0 = vmov 0.0   ;;  %vm614_vm0 = vmmov 0   ;;  %v482_v1 = vld [vmem:[#allocation5] sm:$0xff]   ;;  %v81_v2 = vld [vmem:[#allocation2] sm:$0xff] }
  0x34   :  { %427 = vmatprep.subr.bf16.mxu0 %v613_v0  ;;  %429 = vmatprep.mubr.msk.bf16.mxu0 %vm614_vm0, %v613_v0  ;;  %v82_v3 = vpack.c.bf16 %v81_v2, %v81_v2  ;;  %vm98_vm1 = vcmask 130048   ;;  %v483_v4 = vld [vmem:[#allocation7 + $0x38] sm:$0xff]   ;;  %v484_v5 = vld [vmem:[#allocation7 + $0x30] sm:$0xff]   ;;  %v485_v6 = vld [vmem:[#allocation7 + $0x28] sm:$0xff]   ;;  %s615_s24 = smov [#allocation10]  }
  0x35   :  { %433 = vmatprep.subr.bf16.mxu1 %v613_v0  ;;  %449 = vmatprep.mubr.msk.bf16.mxu1 %vm614_vm0, %v613_v0  ;;  %v486_v7 = vld [vmem:[#allocation7 + $0x20] sm:$0xff]   ;;  %v487_v8 = vld [vmem:[#allocation7 + $0x18] sm:$0xff]   ;;  %v488_v9 = vld [vmem:[#allocation7 + $0x10] sm:$0xff]   ;;  %s375_s25 = sshll.u32 %s615_s24, 4  ;;  %s376_s25 = int_to_ptr.vmem [resolvable:$true] %s375_s25 }
  0x36   :  { %428 = vmatpush3.bf16.msra.mxu0 %v482_v1  ;;  %434 = vmatpush3.bf16.msra.mxu1 %v483_v4  ;;  %v489_v10 = vld [vmem:[#allocation7 + $0x8] sm:$0xff]   ;;  %v490_v11 = vld [vmem:[#allocation7] sm:$0xff]   ;;  %v491_v12 = vld [vmem:[#allocation8 + $0x38] sm:$0xff]   ;;  %p584_p7 = scmp.lt.s32.totalorder %s376_s25, %s376_s25 }
  0x37   :  { %453 = vmatprep.subr.bf16.mxu0 %v613_v0  ;;  %435 = vmatprep.subr.bf16.mxu1 %v613_v0  ;;  %v492_v13 = vld [vmem:[#allocation8 + $0x30] sm:$0xff]   ;;  %v493_v14 = vld [vmem:[#allocation8 + $0x28] sm:$0xff]   ;;  %v494_v15 = vld [vmem:[#allocation8 + $0x20] sm:$0xff]  }
  0x38   :  { %v495_v16 = vld [vmem:[#allocation8 + $0x18] sm:$0xff]   ;;  %v496_v17 = vld [vmem:[#allocation8 + $0x10] sm:$0xff]   ;;  %v497_v26 = vld [vmem:[#allocation8 + $0x8] sm:$0xff]  }
  0x39   :  { %430 = vmatmul.mubr.msk.bf16.vlgmr.msra.gmra.mxu0 %vm98_vm1, %v82_v3  ;;  %v386_v18 = vld [vmem:[%s711_s2] ss:$0 sm:$0xff]  ;;  %v498_v27 = vld [vmem:[#allocation8] sm:$0xff]  }
  0x3a   :  { %469 = vmatprep.mubr.msk.bf16.mxu0 %vm614_vm0, %v613_v0  ;;  %436 = vmatpush3.bf16.msra.mxu1 %v484_v5  ;;  %v389_v28 = vld [vmem:[%s713_s4] ss:$0 sm:$0xff]  ;;  %s579_s4 = scalar_lea.vmem %s376_s25, 128 }
  0x3b   :  { %437 = vmatprep.subr.bf16.mxu1 %v613_v0  ;;  %454 = vmatpush3.bf16.msra.mxu0 %v491_v12  ;;  %v398_v36 = vld [vmem:[%s715_s6] ss:$0 sm:$0xff]  ;;  %p580_p6 = scmp.ne.s32.totalorder %s376_s25, %s579_s4  ;;  %p585_p8 = scmp.lt.s32.totalorder %s579_s4, %s579_s4 }
  0x3c   :  { %455 = vmatprep.subr.bf16.mxu0 %v613_v0 }
  0x3d   :  { %p586_p9 = por %p585_p8, %p584_p7 }
  0x3e   :  { %438 = vmatpush3.bf16.msra.mxu1 %v485_v6 }
  0x3f   :  { %439 = vmatprep.subr.bf16.mxu1 %v613_v0  ;;  %456 = vmatpush3.bf16.msra.mxu0 %v492_v13  ;;  %p587_p10 = pnand %p586_p9, %p580_p6 }
  0x40   :  { %457 = vmatprep.subr.bf16.mxu0 %v613_v0 }
  0x42   :  { %440 = vmatpush3.bf16.msra.mxu1 %v486_v7 }
  0x43   :  { %441 = vmatprep.subr.bf16.mxu1 %v613_v0  ;;  %458 = vmatpush3.bf16.msra.mxu0 %v493_v14 }
  0x44   :  { %459 = vmatprep.subr.bf16.mxu0 %v613_v0 }
  0x46   :  { %442 = vmatpush3.bf16.msra.mxu1 %v487_v8 }
  0x47   :  { %443 = vmatprep.subr.bf16.mxu1 %v613_v0  ;;  %460 = vmatpush3.bf16.msra.mxu0 %v494_v15 }
  0x48   :  { %461 = vmatprep.subr.bf16.mxu0 %v613_v0 }
  0x4a   :  { %444 = vmatpush3.bf16.msra.mxu1 %v488_v9 }
  0x4b   :  { %445 = vmatprep.subr.bf16.mxu1 %v613_v0  ;;  %462 = vmatpush3.bf16.msra.mxu0 %v495_v16 }
  0x4c   :  { %463 = vmatprep.subr.bf16.mxu0 %v613_v0 }
  0x4e   :  { %446 = vmatpush3.bf16.msra.mxu1 %v489_v10 }
  0x4f   :  { %447 = vmatprep.subr.bf16.mxu1 %v613_v0  ;;  %464 = vmatpush3.bf16.msra.mxu0 %v496_v17 }
  0x50   :  { %465 = vmatprep.subr.bf16.mxu0 %v613_v0 }
  0x52   :  { %448 = vmatpush3.bf16.msra.mxu1 %v490_v11 }
  0x53   :  { %466 = vmatpush3.bf16.msra.mxu0 %v497_v26 }
  0x54   :  { %467 = vmatprep.subr.bf16.mxu0 %v613_v0 }
  0x57   :  { %468 = vmatpush3.bf16.msra.mxu0 %v498_v27 }
  0xf9   :  { %v136_v19 = vpop.f32.mrf.mxu0 }
  0xfa   :  { %v137_v20 = vadd.f32 %v386_v18, %v136_v19 }
  0xfb   :  { %v431_v21 = vpop.f32.mrf.mxu0 }
  0xfc   :  { %v142_v22 = vmax.f32 %v137_v20, 0.0 }
  0xfd   :  { %v139_v23 = vpop.f32.mrf.mxu0 }
  0xfe   :  { %v143_v24 = vpack.c.bf16 %v142_v22, %v142_v22 }
  0xff   :  { %v432_v25 = vpop.f32.mrf.mxu0 }
 0x100   :  { %450 = vmatmul.mubr.bf16.vlgmr.msra.gmra.mxu1 %v143_v24 }
 0x1c0   :  { %v249_v29 = vpop.f32.mrf.mxu1 }
 0x1c1   :  { %v250_v30 = vadd.f32 %v389_v28, %v249_v29 }
 0x1c2   :  { %v451_v31 = vpop.f32.mrf.mxu1 }
 0x1c3   :  { %v255_v32 = vmax.f32 %v250_v30, 0.0 }
 0x1c4   :  { %v252_v33 = vpop.f32.mrf.mxu1 }
 0x1c5   :  { %v256_v34 = vpack.c.bf16 %v255_v32, %v255_v32 }
 0x1c6   :  { %v452_v35 = vpop.f32.mrf.mxu1 }
 0x1c7   :  { %470 = vmatmul.mubr.bf16.vlgmr.msra.gmra.mxu0 %v256_v34 }
 0x287   :  { %v362_v37 = vpop.f32.mrf.mxu0 }
 0x288   :  { %v363_v38 = vadd.f32 %v398_v36, %v362_v37 }
 0x289   :  { %v471_v39 = vpop.f32.mrf.mxu0 }
 0x28a   :  { %368 = vst [vmem:[#allocation10] sm:$0xff] %v363_v38 }
 0x28b   :  { %v365_v40 = vpop.f32.mrf.mxu0 }
 0x28c   :  { %590 = shalt.err (!%p587_p10)
}
 0x28d   :  { %378 = dma.vmem_to_hbm [thread:$0]  %s376_s25, 128, %s716_s7, [#allocation4]   ;;  %v472_v41 = vpop.f32.mrf.mxu0 }
 0x28e   :  { %605 = dma.done.wait [#allocation4], 128  }
 0x28f   :  { %606 = vsyncadd [#allocation4], 4294967168 }
 0x290   :  { %382 = vsyncpa [#allocation3], 1 }
 0x291   :  { %383 = vsyncpa [#allocation6], 1 }
 0x292   :  { %384 = vsyncpa [#allocation9], 1 }
 0x293   :  { %385 = vsyncpa [#allocation4], 1 }

</bundles_post_ra>
